<compile_context>
chip_gen: v7x
topology: tpu7x:2x2x1
jax: 0.10.0
libtpu: 0.0.40
codegen_flags: <defaults>
</compile_context>

<pallas_src>
import functools
import math
import re
from typing import NamedTuple

import jax
import jax.numpy as jnp
from jax.experimental import pallas as pl
from jax.experimental.pallas import tpu as pltpu


MAX_VAL = 127.0  # nemo=False path of the PyTorch module


# ---------------------------------------------------------------------------
# Kernel
# ---------------------------------------------------------------------------
@functools.lru_cache(maxsize=None)
def _make_kernel(acc_dtype_name):
    """Tiled matmul over pre-quantized operands + fused dequant/bias epilogue.

    acc_dtype_name: "int32" for the int8 MXU path (v5e/v6e), "float32" for bf16.
    """
    acc_dtype = jnp.dtype(acc_dtype_name)

    def kernel(inv_scale_ref, x_ref, w_ref, b_ref, o_ref):
        # inv_scale_ref : SMEM (1,)      f32       -- 1 / (scale_a * scale_w)
        # x_ref         : VMEM (tm, tk)  int8/bf16 -- quantized input tile
        # w_ref         : VMEM (tk, tn)  int8/bf16 -- quantized weight tile (K, N)
        # b_ref         : VMEM (1, tn)   f32       -- dequantized bias (qb/scale_b)
        # o_ref         : VMEM (tm, tn)  f32       -- output tile; doubles as the
        #                                             accumulator (block index
        #                                             ignores k -> VMEM-resident)
        k = pl.program_id(2)

        @pl.when(k == 0)
        def _():
            o_ref[...] = jnp.zeros_like(o_ref)

        o_ref[...] += jnp.dot(
            x_ref[...], w_ref[...], preferred_element_type=acc_dtype
        ).astype(jnp.float32)

        @pl.when(k == pl.num_programs(2) - 1)
        def _():
            o_ref[...] = o_ref[...] * inv_scale_ref[0] + b_ref[...]

    return kernel


# ---------------------------------------------------------------------------
# Helpers
# ---------------------------------------------------------------------------
def _ceil_to(v, m):
    return -(-v // m) * m


def _pick_tile(dim, max_tile, granule):
    """Pick (tile, padded_dim) with padded_dim % tile == 0 and tile <= max_tile.

    If the whole dim fits in one tile the full (unpadded) dim is used — a
    full-extent block is exempt from the (8, 128) divisibility rule.  Otherwise
    tiles are multiples of `granule` and padding is bounded by
    n_blocks * granule (fixes the old clamp-then-repad ~2x inflation).
    """
    if dim <= max_tile:
        return dim, dim
    max_tile = max(granule, (max_tile // granule) * granule)
    padded = _ceil_to(dim, granule)
    n_blocks = -(-padded // max_tile)
    tile = _ceil_to(-(-padded // n_blocks), granule)
    return tile, tile * n_blocks


def _abs_max_scale(t, max_val):
    m = jnp.max(jnp.abs(t))
    m = jnp.where(m == 0.0, jnp.float32(1.0), m).astype(jnp.float32)
    return max_val / m


def _quantize(t, scale, max_val):
    return jnp.clip(jnp.round(scale * t), -max_val, max_val)


def _tpu_generation():
    try:
        kind = jax.devices()[0].device_kind
    except Exception:
        return 0
    m = re.search(r"(\d+)", kind)
    return int(m.group(1)) if m else 0


def _hw_config(generation):
    """(tm_max, tn_max, use_int8, vmem_cap_bytes) per TPU generation."""
    MiB = 1024 * 1024
    if generation == 5:        # v5e/v5p: int8 MXU @ 2x bf16, lowest HBM BW
        return 512, 512, True, 96 * MiB
    if generation == 6:        # v6e: ~640 FLOP/B balance -> ~1024 output tiles
        return 1024, 1024, True, 96 * MiB
    if generation >= 7:        # v7x: 64 MiB VMEM, MXU has no int path -> bf16
        return 1024, 1024, False, 48 * MiB
    return 512, 512, False, 32 * MiB  # unknown / older: conservative bf16


# ---------------------------------------------------------------------------
# One-time weight-side preparation (hoisted out of the per-call path)
# ---------------------------------------------------------------------------
class PreparedAdaptLinear(NamedTuple):
    qw: jax.Array          # (Kp, Np) int8/bf16, quantized, transposed, padded
    bias: jax.Array        # (1, Np)  f32, dequantized bias (qb / scale_b), padded
    scale_w: jax.Array     # ()       f32
    size_in: int
    size_out: int
    Kp: int
    Np: int
    tk: int
    tn: int
    tm_max: int
    op_dtype: object
    acc_dtype_name: str
    vmem_cap: int


def prepare_adapt_linear(weight, bias, *, max_val=MAX_VAL, use_int8=None,
                         generation=None):
    """Weight/bias prep done once per layer (weights are constant across calls)."""
    N, K = weight.shape
    weight = jnp.asarray(weight, jnp.float32)
    bias = (jnp.zeros((N,), jnp.float32) if bias is None
            else jnp.asarray(bias, jnp.float32))

    if generation is None:
        generation = _tpu_generation()
    tm_max, tn_max, int8_default, vmem_cap = _hw_config(generation)
    if use_int8 is None:
        use_int8 = int8_default
    op_dtype = jnp.int8 if use_int8 else jnp.bfloat16
    acc_dtype_name = "int32" if use_int8 else "float32"

    # --- global quantization, exactly as the PyTorch module ---
    scale_w = _abs_max_scale(weight, max_val)
    scale_b = _abs_max_scale(bias, max_val)
    qw = _quantize(weight, scale_w, max_val).astype(op_dtype).T      # (K, N)
    deq_bias = (_quantize(bias, scale_b, max_val) / scale_b).astype(jnp.float32)

    # --- tiling decisions (N/K side, fixed per layer) ---
    # N is padded to a lane multiple (128) once so output stores are lane-dense.
    Np0 = _ceil_to(N, 128)
    tn, Np = _pick_tile(Np0, tn_max, 128)
    if generation >= 7 and Np // tn == 1 and Np >= 256:
        # v7x has two TensorCores; give the "parallel" grid >= 2 blocks.
        tn, Np = _pick_tile(Np, max(128, Np // 2), 128)
    # K small enough -> single K block (K grid axis collapses to one step,
    # longer contiguous DMAs, no per-step accumulator branching in steady state).
    if K <= 2048:
        tk, Kp = K, K
    else:
        tk, Kp = _pick_tile(K, 512, 128)

    if (Kp, Np) != (K, N):
        qw = jnp.pad(qw, ((0, Kp - K), (0, Np - N)))
    bias2d = deq_bias.reshape(1, N)
    if Np != N:
        bias2d = jnp.pad(bias2d, ((0, 0), (0, Np - N)))

    return PreparedAdaptLinear(
        qw=qw, bias=bias2d, scale_w=scale_w.astype(jnp.float32),
        size_in=K, size_out=N, Kp=Kp, Np=Np, tk=tk, tn=tn, tm_max=tm_max,
        op_dtype=op_dtype, acc_dtype_name=acc_dtype_name, vmem_cap=vmem_cap)


# ---------------------------------------------------------------------------
# Per-call forward
# ---------------------------------------------------------------------------
def adapt_linear_apply(x, prep, *, max_val=MAX_VAL):
    """x: (B, size_in) f32 -> (B, size_out) f32."""
    B, K = x.shape
    assert K == prep.size_in, "input feature size mismatch"
    x = jnp.asarray(x, jnp.float32)

    # per-call activation quantization (whole-tensor abs-max, as in the module)
    scale_a = _abs_max_scale(x, max_val)
    qx = _quantize(x, scale_a, max_val).astype(prep.op_dtype)

    tm, Mp = _pick_tile(B, prep.tm_max, 8)
    if (Mp, prep.Kp) != (B, K):
        qx = jnp.pad(qx, ((0, Mp - B), (0, prep.Kp - K)))

    inv_scale = (1.0 / (scale_a * prep.scale_w)).astype(jnp.float32).reshape(1)

    tk, tn = prep.tk, prep.tn
    grid = (Mp // tm, prep.Np // tn, prep.Kp // tk)

    op_bytes = jnp.dtype(prep.op_dtype).itemsize
    vmem_est = (2 * (tm * tk + tk * tn) * op_bytes   # double-buffered x / w tiles
                + 2 * tn * 4                         # bias tile
                + 2 * tm * tn * 4)                   # f32 output/accumulator
    vmem_limit = int(min(prep.vmem_cap,
                         max(32 * 1024 * 1024, vmem_est * 5 // 4)))

    out = pl.pallas_call(
        _make_kernel(prep.acc_dtype_name),
        out_shape=jax.ShapeDtypeStruct((Mp, prep.Np), jnp.float32),
        grid_spec=pltpu.PrefetchScalarGridSpec(
            num_scalar_prefetch=0,
            grid=grid,
            in_specs=[
                pl.BlockSpec(memory_space=pltpu.MemorySpace.SMEM),         # inv_scale
                pl.BlockSpec((tm, tk), lambda i, j, k: (i, k)),            # quantized x
                pl.BlockSpec((tk, tn), lambda i, j, k: (k, j)),            # quantized w (K, N)
                pl.BlockSpec((1, tn), lambda i, j, k: (0, j)),             # dequantized bias
            ],
            out_specs=pl.BlockSpec((tm, tn), lambda i, j, k: (i, j)),
        ),
        compiler_params=pltpu.CompilerParams(
            dimension_semantics=("parallel", "parallel", "arbitrary"),
            vmem_limit_bytes=vmem_limit,
        ),
    )(inv_scale, qx, prep.qw, prep.bias)

    return out[:B, :prep.size_out]


def adapt_linear(x, weight, bias, *, max_val=MAX_VAL, use_int8=None):
    """Convenience one-shot wrapper (prep + apply).  For repeated calls with the
    same weights, call prepare_adapt_linear once and adapt_linear_apply per call."""
    prep = prepare_adapt_linear(weight, bias, max_val=max_val, use_int8=use_int8)
    return adapt_linear_apply(x, prep, max_val=max_val)


# ---------------------------------------------------------------------------
# Pure-JAX reference of the same quantized forward pass
# ---------------------------------------------------------------------------
def _reference(x, weight, bias, max_val=MAX_VAL):
    sw = _abs_max_scale(weight, max_val)
    sa = _abs_max_scale(x, max_val)
    sb = _abs_max_scale(bias, max_val)
    qw = _quantize(weight, sw, max_val)
    qx = _quantize(x, sa, max_val)
    qb = _quantize(bias, sb, max_val)
    return qx @ qw.T / (sa * sw) + qb / sb


if __name__ == "__main__":
    # Small shapes consistent with a Linear layer: batch=8, size_in=32, size_out=16.
    size_in, size_out, batch = 32, 16, 8

    key = jax.random.PRNGKey(0)
    kx, kw, kb = jax.random.split(key, 3)

    # Deterministic init mirroring nn.init.kaiming_uniform_(a=sqrt(5)) + bias bound.
    fan_in = size_in
    bound = 1.0 / math.sqrt(fan_in)
    weight = jax.random.uniform(kw, (size_out, size_in), jnp.float32,
                                minval=-bound, maxval=bound)
    bias = jax.random.uniform(kb, (size_out,), jnp.float32,
                              minval=-bound, maxval=bound)
    x = jax.random.normal(kx, (batch, size_in), jnp.float32)

    # Weight-side prep is done ONCE (hoisted out of the per-call path).
    prep = prepare_adapt_linear(weight, bias)
    try:
        out = jax.block_until_ready(adapt_linear_apply(x, prep))
    except Exception:
        # Portable fallback: if the int8 MXU path is unavailable on this chip /
        # jax build, redo prep with the bf16 integer path (exact for |v| <= 127).
        prep = prepare_adapt_linear(weight, bias, use_int8=False)
        out = jax.block_until_ready(adapt_linear_apply(x, prep))

    ref = _reference(x, weight, bias)
    assert out.shape == (batch, size_out)
    assert jnp.allclose(out, ref, atol=1e-4, rtol=1e-4), "mismatch vs reference"

    print("KERNEL_OK")
</pallas_src>

<mosaic_0001>
module attributes {stable_mosaic.version = 11 : i64} {
  func.func @kernel(%arg0: i32, %arg1: i32, %arg2: i32, %arg3: memref<1xf32, #tpu.memory_space<smem>>, %arg4: memref<8x32xbf16, #tpu.memory_space<vmem>>, %arg5: memref<32x128xbf16, #tpu.memory_space<vmem>>, %arg6: memref<1x128xf32, #tpu.memory_space<vmem>>, %arg7: memref<8x128xf32, #tpu.memory_space<vmem>>) attributes {dimension_semantics = [#tpu.dimension_semantics<parallel>, #tpu.dimension_semantics<parallel>, #tpu.dimension_semantics<arbitrary>], iteration_bounds = array<i64: 1, 1, 1>, scalar_prefetch = 0 : i64, scratch_operands = 0 : i64, tpu.core_type = #tpu.core_type<tc>, window_params = [{transform_indices = @transform_0, window_bounds = array<i64: 1>}, {transform_indices = @transform_1, window_bounds = array<i64: 8, 32>}, {transform_indices = @transform_2, window_bounds = array<i64: 32, 128>}, {transform_indices = @transform_3, window_bounds = array<i64: 1, 128>}, {transform_indices = @transform_4, window_bounds = array<i64: 8, 128>}]} {
    %c0_i32 = arith.constant 0 : i32
    %0 = arith.cmpi eq, %arg2, %c0_i32 : i32
    %1 = arith.extui %0 : i1 to i32
    %c0_i32_0 = arith.constant 0 : i32
    %2 = arith.cmpi ne, %1, %c0_i32_0 : i32
    scf.if %2 {
      %cst_10 = arith.constant 0.000000e+00 : f32
      %12 = vector.broadcast %cst_10 : f32 to vector<8x128xf32>
      %c0_11 = arith.constant 0 : index
      %c0_12 = arith.constant 0 : index
      %13 = vector.load %arg7[%c0_11, %c0_12] : memref<8x128xf32, #tpu.memory_space<vmem>>, vector<8x128xf32>
      tpu.vector_store %arg7[%c0_11, %c0_12], %12 {strides = array<i32>} : memref<8x128xf32, #tpu.memory_space<vmem>>, vector<8x128xf32>,
    } else {
    }
    %c0 = arith.constant 0 : index
    %c0_1 = arith.constant 0 : index
    %3 = vector.load %arg7[%c0, %c0_1] : memref<8x128xf32, #tpu.memory_space<vmem>>, vector<8x128xf32>
    %c0_2 = arith.constant 0 : index
    %c0_3 = arith.constant 0 : index
    %4 = vector.load %arg4[%c0_2, %c0_3] : memref<8x32xbf16, #tpu.memory_space<vmem>>, vector<8x32xbf16>
    %c0_4 = arith.constant 0 : index
    %c0_5 = arith.constant 0 : index
    %5 = vector.load %arg5[%c0_4, %c0_5] : memref<32x128xbf16, #tpu.memory_space<vmem>>, vector<32x128xbf16>
    %cst = arith.constant dense<0.000000e+00> : vector<8x128xf32>
    %6 = tpu.matmul %4, %5, %cst {dimension_numbers = #tpu.dot_dimension_numbers<[1], [0], [0], [1], [0, 0, 1, 1], [], []>} : vector<8x32xbf16>, vector<32x128xbf16>, vector<8x128xf32> -> vector<8x128xf32>
    %7 = arith.addf %3, %6 : vector<8x128xf32>
    %c0_6 = arith.constant 0 : index
    %c0_7 = arith.constant 0 : index
    %8 = vector.load %arg7[%c0_6, %c0_7] : memref<8x128xf32, #tpu.memory_space<vmem>>, vector<8x128xf32>
    tpu.vector_store %arg7[%c0_6, %c0_7], %7 {strides = array<i32>} : memref<8x128xf32, #tpu.memory_space<vmem>>, vector<8x128xf32>,
    %c0_i32_8 = arith.constant 0 : i32
    %9 = arith.cmpi eq, %arg2, %c0_i32_8 : i32
    %10 = arith.extui %9 : i1 to i32
    %c0_i32_9 = arith.constant 0 : i32
    %11 = arith.cmpi ne, %10, %c0_i32_9 : i32
    scf.if %11 {
      %c0_10 = arith.constant 0 : index
      %c0_11 = arith.constant 0 : index
      %12 = vector.load %arg7[%c0_10, %c0_11] : memref<8x128xf32, #tpu.memory_space<vmem>>, vector<8x128xf32>
      %c0_12 = arith.constant 0 : index
      %13 = memref.load %arg3[%c0_12] : memref<1xf32, #tpu.memory_space<smem>>
      %14 = vector.broadcast %13 : f32 to vector<8x128xf32>
      %15 = arith.mulf %12, %14 : vector<8x128xf32>
      %c0_13 = arith.constant 0 : index
      %c0_14 = arith.constant 0 : index
      %16 = vector.load %arg6[%c0_13, %c0_14] : memref<1x128xf32, #tpu.memory_space<vmem>>, vector<1x128xf32>
      %17 = vector.broadcast %16 : vector<1x128xf32> to vector<8x128xf32>
      %18 = arith.addf %15, %17 : vector<8x128xf32>
      %c0_15 = arith.constant 0 : index
      %c0_16 = arith.constant 0 : index
      %19 = vector.load %arg7[%c0_15, %c0_16] : memref<8x128xf32, #tpu.memory_space<vmem>>, vector<8x128xf32>
      tpu.vector_store %arg7[%c0_15, %c0_16], %18 {strides = array<i32>} : memref<8x128xf32, #tpu.memory_space<vmem>>, vector<8x128xf32>,
    } else {
    }
    return
  }
  func.func @transform_0(%arg0: i32, %arg1: i32, %arg2: i32) -> i32 {
    %c0_i32 = arith.constant 0 : i32
    %c0_i32_0 = arith.constant 0 : i32
    return %c0_i32 : i32
  }
  func.func @transform_1(%arg0: i32, %arg1: i32, %arg2: i32) -> (i32, i32) {
    %c0_i32 = arith.constant 0 : i32
    return %arg0, %arg2 : i32, i32
  }
  func.func @transform_2(%arg0: i32, %arg1: i32, %arg2: i32) -> (i32, i32) {
    %c0_i32 = arith.constant 0 : i32
    return %arg2, %arg1 : i32, i32
  }
  func.func @transform_3(%arg0: i32, %arg1: i32, %arg2: i32) -> (i32, i32) {
    %c0_i32 = arith.constant 0 : i32
    %c0_i32_0 = arith.constant 0 : i32
    return %c0_i32, %arg1 : i32, i32
  }
  func.func @transform_4(%arg0: i32, %arg1: i32, %arg2: i32) -> (i32, i32) {
    %c0_i32 = arith.constant 0 : i32
    return %arg0, %arg1 : i32, i32
  }
}

module attributes {stable_mosaic.version = 11 : i64} {
  func.func @kernel(%arg0: i32, %arg1: i32, %arg2: i32, %arg3: memref<1xf32, #tpu.memory_space<smem>>, %arg4: memref<8x32xbf16, #tpu.memory_space<vmem>>, %arg5: memref<32x128xbf16, #tpu.memory_space<vmem>>, %arg6: memref<1x128xf32, #tpu.memory_space<vmem>>, %arg7: memref<8x128xf32, #tpu.memory_space<vmem>>) attributes {dimension_semantics = [#tpu.dimension_semantics<parallel>, #tpu.dimension_semantics<parallel>, #tpu.dimension_semantics<arbitrary>], iteration_bounds = array<i64: 1, 1, 1>, scalar_prefetch = 0 : i64, scratch_operands = 0 : i64, tpu.core_type = #tpu.core_type<tc>, window_params = [{transform_indices = @transform_0, window_bounds = array<i64: 1>}, {transform_indices = @transform_1, window_bounds = array<i64: 8, 32>}, {transform_indices = @transform_2, window_bounds = array<i64: 32, 128>}, {transform_indices = @transform_3, window_bounds = array<i64: 1, 128>}, {transform_indices = @transform_4, window_bounds = array<i64: 8, 128>}]} {
    %c0_i32 = arith.constant 0 : i32
    %0 = arith.cmpi eq, %arg2, %c0_i32 : i32
    %1 = arith.extui %0 : i1 to i32
    %c0_i32_0 = arith.constant 0 : i32
    %2 = arith.cmpi ne, %1, %c0_i32_0 : i32
    scf.if %2 {
      %cst_10 = arith.constant 0.000000e+00 : f32
      %12 = vector.broadcast %cst_10 : f32 to vector<8x128xf32>
      %c0_11 = arith.constant 0 : index
      %c0_12 = arith.constant 0 : index
      %13 = vector.load %arg7[%c0_11, %c0_12] : memref<8x128xf32, #tpu.memory_space<vmem>>, vector<8x128xf32>
      tpu.vector_store %arg7[%c0_11, %c0_12], %12 {strides = array<i32>} : memref<8x128xf32, #tpu.memory_space<vmem>>, vector<8x128xf32>,
    } else {
    }
    %c0 = arith.constant 0 : index
    %c0_1 = arith.constant 0 : index
    %3 = vector.load %arg7[%c0, %c0_1] : memref<8x128xf32, #tpu.memory_space<vmem>>, vector<8x128xf32>
    %c0_2 = arith.constant 0 : index
    %c0_3 = arith.constant 0 : index
    %4 = vector.load %arg4[%c0_2, %c0_3] : memref<8x32xbf16, #tpu.memory_space<vmem>>, vector<8x32xbf16>
    %c0_4 = arith.constant 0 : index
    %c0_5 = arith.constant 0 : index
    %5 = vector.load %arg5[%c0_4, %c0_5] : memref<32x128xbf16, #tpu.memory_space<vmem>>, vector<32x128xbf16>
    %cst = arith.constant dense<0.000000e+00> : vector<8x128xf32>
    %6 = tpu.matmul %4, %5, %cst {dimension_numbers = #tpu.dot_dimension_numbers<[1], [0], [0], [1], [0, 0, 1, 1], [], []>} : vector<8x32xbf16>, vector<32x128xbf16>, vector<8x128xf32> -> vector<8x128xf32>
    %7 = arith.addf %3, %6 : vector<8x128xf32>
    %c0_6 = arith.constant 0 : index
    %c0_7 = arith.constant 0 : index
    %8 = vector.load %arg7[%c0_6, %c0_7] : memref<8x128xf32, #tpu.memory_space<vmem>>, vector<8x128xf32>
    tpu.vector_store %arg7[%c0_6, %c0_7], %7 {strides = array<i32>} : memref<8x128xf32, #tpu.memory_space<vmem>>, vector<8x128xf32>,
    %c0_i32_8 = arith.constant 0 : i32
    %9 = arith.cmpi eq, %arg2, %c0_i32_8 : i32
    %10 = arith.extui %9 : i1 to i32
    %c0_i32_9 = arith.constant 0 : i32
    %11 = arith.cmpi ne, %10, %c0_i32_9 : i32
    scf.if %11 {
      %c0_10 = arith.constant 0 : index
      %c0_11 = arith.constant 0 : index
      %12 = vector.load %arg7[%c0_10, %c0_11] : memref<8x128xf32, #tpu.memory_space<vmem>>, vector<8x128xf32>
      %c0_12 = arith.constant 0 : index
      %13 = memref.load %arg3[%c0_12] : memref<1xf32, #tpu.memory_space<smem>>
      %14 = vector.broadcast %13 : f32 to vector<8x128xf32>
      %15 = arith.mulf %12, %14 : vector<8x128xf32>
      %c0_13 = arith.constant 0 : index
      %c0_14 = arith.constant 0 : index
      %16 = vector.load %arg6[%c0_13, %c0_14] : memref<1x128xf32, #tpu.memory_space<vmem>>, vector<1x128xf32>
      %17 = vector.broadcast %16 : vector<1x128xf32> to vector<8x128xf32>
      %18 = arith.addf %15, %17 : vector<8x128xf32>
      %c0_15 = arith.constant 0 : index
      %c0_16 = arith.constant 0 : index
      %19 = vector.load %arg7[%c0_15, %c0_16] : memref<8x128xf32, #tpu.memory_space<vmem>>, vector<8x128xf32>
      tpu.vector_store %arg7[%c0_15, %c0_16], %18 {strides = array<i32>} : memref<8x128xf32, #tpu.memory_space<vmem>>, vector<8x128xf32>,
    } else {
    }
    return
  }
  func.func @transform_0(%arg0: i32, %arg1: i32, %arg2: i32) -> i32 {
    %c0_i32 = arith.constant 0 : i32
    %c0_i32_0 = arith.constant 0 : i32
    return %c0_i32 : i32
  }
  func.func @transform_1(%arg0: i32, %arg1: i32, %arg2: i32) -> (i32, i32) {
    %c0_i32 = arith.constant 0 : i32
    return %arg0, %arg2 : i32, i32
  }
  func.func @transform_2(%arg0: i32, %arg1: i32, %arg2: i32) -> (i32, i32) {
    %c0_i32 = arith.constant 0 : i32
    return %arg2, %arg1 : i32, i32
  }
  func.func @transform_3(%arg0: i32, %arg1: i32, %arg2: i32) -> (i32, i32) {
    %c0_i32 = arith.constant 0 : i32
    %c0_i32_0 = arith.constant 0 : i32
    return %c0_i32, %arg1 : i32, i32
  }
  func.func @transform_4(%arg0: i32, %arg1: i32, %arg2: i32) -> (i32, i32) {
    %c0_i32 = arith.constant 0 : i32
    return %arg0, %arg1 : i32, i32
  }
}

</mosaic_0001>

<bundles_post_ra>
// kernel: tpu_custom_call.1
= control target key start
LH: loop header
LB: loop body
LE: loop exit
PB: predicated region body
PF: predicated region fallthrough
CT: control target
= control target key end

     0   :  { %10 = vsyncpa [#allocation4], 0  ;;  %s324_s0 = inlined_call_operand.<no memory space> [shape: f32[1], index: 0, kind: input, shape index: {}]   ;;  %s325_s1 = inlined_call_operand.hbm [shape: bf16[8,32], index: 1, kind: input, shape index: {}]   ;;  %s326_s2 = inlined_call_operand.hbm [shape: bf16[32,128], index: 2, kind: input, shape index: {}]   ;;  %s327_s3 = inlined_call_operand.vmem [shape: f32[1,128], index: 3, kind: input, shape index: {}]   ;;  %s328_s4 = inlined_call_operand.hbm [shape: f32[8,128], index: 4, kind: output, shape index: {}]  }
   0x1   :  { %11 = vsyncpa [#allocation7], 0 }
   0x2   :  { %12 = vsyncpa [#allocation5], 0  ;;  %s243_s15 = smov [#allocation3]   ;;  %s244_s17 = smov [#allocation6]  }
   0x3   :  { %s21_s16 = sshll.u32 %s243_s15, 4  ;;  %s30_s18 = sshll.u32 %s244_s17, 4  ;;  %s22_s16 = int_to_ptr.vmem [resolvable:$true] %s21_s16  ;;  %s275_s18 = int_to_ptr.vmem [resolvable:$true] %s30_s18 }
   0x4   :  { %s171_s21 = scalar_lea.hbm %s325_s1, 64 }
   0x5   :  { %p172_p0 = scmp.ne.s32.totalorder %s325_s1, %s171_s21  ;;  %p175_p1 = scmp.lt.u32.totalorder %s171_s21, %s325_s1 }
   0x7   :  { %p177_p2 = pnand %p175_p1, %p172_p0 }
   0x9   :  { %180 = shalt.err (!%p177_p2)
}
   0xa   :  { %s181_s26 = scalar_lea.vmem %s22_s16, 64  ;;  %p186_p4 = scmp.lt.s32.totalorder %s22_s16, %s22_s16 }
   0xb   :  { %p182_p3 = scmp.ne.s32.totalorder %s22_s16, %s181_s26  ;;  %p187_p5 = scmp.lt.s32.totalorder %s181_s26, %s181_s26 }
   0xd   :  { %p188_p6 = por %p187_p5, %p186_p4 }
   0xf   :  { %p189_p7 = pnand %p188_p6, %p182_p3 }
  0x11   :  { %192 = shalt.err (!%p189_p7)
}
  0x12   :  { %24 = dma.hbm_to_vmem [thread:$0]  %s325_s1, 64, %s22_s16, [#allocation4]  }
  0x13   :  { %s193_s5 = scalar_lea.hbm %s326_s2, 256 }
  0x14   :  { %p194_p8 = scmp.ne.s32.totalorder %s326_s2, %s193_s5  ;;  %p197_p9 = scmp.lt.u32.totalorder %s193_s5, %s326_s2 }
  0x16   :  { %p199_p10 = pnand %p197_p9, %p194_p8 }
  0x18   :  { %202 = shalt.err (!%p199_p10)
}
  0x19   :  { %s203_s10 = scalar_lea.vmem %s275_s18, 256  ;;  %p208_p12 = scmp.lt.s32.totalorder %s275_s18, %s275_s18 }
  0x1a   :  { %p204_p11 = scmp.ne.s32.totalorder %s275_s18, %s203_s10  ;;  %p209_p13 = scmp.lt.s32.totalorder %s203_s10, %s203_s10 }
  0x1c   :  { %p210_p0 = por %p209_p13, %p208_p12 }
  0x1e   :  { %p211_p1 = pnand %p210_p0, %p204_p11 }
  0x20   :  { %214 = shalt.err (!%p211_p1)
}
  0x21   :  { %s245_s1 = smov 64   ;;  %s246_s11 = smov 4  }
  0x22   :  { %36 = dma.hbm_to_vmem [thread:$0]  %s326_s2, 256, %s275_s18, [#allocation7], %s245_s1, %s245_s1, %s246_s11  }
  0x23   :  { %237 = dma.done.wait [#allocation4], 64  }
  0x24   :  { %238 = vsyncadd [#allocation4], 4294967232 }
  0x25   :  { %239 = dma.done.wait [#allocation7], 256  }
  0x26   :  { %240 = vsyncadd [#allocation7], 4294967040  ;;  %v247_v0 = vmov 0.0   ;;  %vm248_vm0 = vmmov 0   ;;  %v169_v1 = vld [vmem:[#allocation6] sm:$0xff]   ;;  %v170_v2 = vld [vmem:[#allocation6 + $0x8] sm:$0xff]   ;;  %v120_v5 = vstv %s324_s0 }
  0x27   :  { %154 = vmatprep.subr.bf16.mxu0 %v247_v0  ;;  %158 = vmatprep.mubr.msk.bf16.mxu0 %vm248_vm0, %v247_v0  ;;  %v52_v3 = vld [vmem:[#allocation3] sm:$0xf]  ;;  %vm69_vm1 = vcmask 261120   ;;  %s249_s17 = smov [#allocation8]  }
  0x28   :  { %155 = vmatpush3.bf16.msra.mxu0 %v169_v1  ;;  %v150_v8 = vld [vmem:[%s327_s3] ss:$0 sm:$0xff]  ;;  %s137_s18 = sshll.u32 %s249_s17, 4  ;;  %s138_s18 = int_to_ptr.vmem [resolvable:$true] %s137_s18 }
  0x29   :  { %156 = vmatprep.subr.bf16.mxu0 %v247_v0  ;;  %s215_s19 = scalar_lea.vmem %s138_s18, 128  ;;  %p220_p3 = scmp.lt.s32.totalorder %s138_s18, %s138_s18 }
  0x2a   :  { %p216_p2 = scmp.ne.s32.totalorder %s138_s18, %s215_s19  ;;  %p221_p4 = scmp.lt.s32.totalorder %s215_s19, %s215_s19 }
  0x2c   :  { %157 = vmatpush3.bf16.msra.mxu0 %v170_v2  ;;  %p222_p5 = por %p221_p4, %p220_p3 }
  0x2e   :  { %p223_p6 = pnand %p222_p5, %p216_p2 }
  0x2f   :  { %159 = vmatmul.mubr.msk.bf16.vlgmr.msra.gmra.mrb[0].mxu0 %vm69_vm1, %v52_v3 }
 0x102   :  { %v107_v4 = vpop.f32.mrb[0].mxu0 }
 0x103   :  { %v160_v6 = vpop.f32.mrb[1].mxu0  ;;  %v121_v10 = vmul.f32 %v120_v5, %v107_v4 }
 0x104   :  { %v110_v7 = vpop.f32.mrb[2].mxu0 }
 0x105   :  { %v161_v9 = vpop.f32.mrb[3].mxu0  ;;  %v129_v11 = vadd.f32 %v150_v8, %v121_v10 }
 0x107   :  { %130 = vst [vmem:[#allocation8] sm:$0xff] %v129_v11 }
 0x108   :  { %226 = shalt.err (!%p223_p6)
}
 0x109   :  { %s227_s21 = scalar_lea.hbm %s328_s4, 128 }
 0x10a   :  { %p228_p7 = scmp.ne.s32.totalorder %s328_s4, %s227_s21  ;;  %p231_p8 = scmp.lt.u32.totalorder %s227_s21, %s328_s4 }
 0x10c   :  { %p233_p9 = pnand %p231_p8, %p228_p7 }
 0x10e   :  { %236 = shalt.err (!%p233_p9)
}
 0x10f   :  { %140 = dma.vmem_to_hbm [thread:$0]  %s138_s18, 128, %s328_s4, [#allocation5]  }
 0x110   :  { %241 = dma.done.wait [#allocation5], 128  }
 0x111   :  { %242 = vsyncadd [#allocation5], 4294967168 }
 0x112   :  { %144 = vsyncpa [#allocation4], 1 }
 0x113   :  { %145 = vsyncpa [#allocation7], 1 }
 0x114   :  { %146 = vsyncpa [#allocation5], 1 }

// kernel: tpu_custom_call.1
= control target key start
LH: loop header
LB: loop body
LE: loop exit
PB: predicated region body
PF: predicated region fallthrough
CT: control target
= control target key end

     0   :  { %10 = vsyncpa [#allocation4], 0  ;;  %s324_s0 = inlined_call_operand.<no memory space> [shape: f32[1], index: 0, kind: input, shape index: {}]   ;;  %s325_s1 = inlined_call_operand.hbm [shape: bf16[8,32], index: 1, kind: input, shape index: {}]   ;;  %s326_s2 = inlined_call_operand.hbm [shape: bf16[32,128], index: 2, kind: input, shape index: {}]   ;;  %s327_s3 = inlined_call_operand.vmem [shape: f32[1,128], index: 3, kind: input, shape index: {}]   ;;  %s328_s4 = inlined_call_operand.hbm [shape: f32[8,128], index: 4, kind: output, shape index: {}]  }
   0x1   :  { %11 = vsyncpa [#allocation7], 0 }
   0x2   :  { %12 = vsyncpa [#allocation5], 0  ;;  %s243_s15 = smov [#allocation3]   ;;  %s244_s17 = smov [#allocation6]  }
   0x3   :  { %s21_s16 = sshll.u32 %s243_s15, 4  ;;  %s30_s18 = sshll.u32 %s244_s17, 4  ;;  %s22_s16 = int_to_ptr.vmem [resolvable:$true] %s21_s16  ;;  %s275_s18 = int_to_ptr.vmem [resolvable:$true] %s30_s18 }
   0x4   :  { %s171_s21 = scalar_lea.hbm %s325_s1, 64 }
   0x5   :  { %p172_p0 = scmp.ne.s32.totalorder %s325_s1, %s171_s21  ;;  %p175_p1 = scmp.lt.u32.totalorder %s171_s21, %s325_s1 }
   0x7   :  { %p177_p2 = pnand %p175_p1, %p172_p0 }
   0x9   :  { %180 = shalt.err (!%p177_p2)
}
   0xa   :  { %s181_s26 = scalar_lea.vmem %s22_s16, 64  ;;  %p186_p4 = scmp.lt.s32.totalorder %s22_s16, %s22_s16 }
   0xb   :  { %p182_p3 = scmp.ne.s32.totalorder %s22_s16, %s181_s26  ;;  %p187_p5 = scmp.lt.s32.totalorder %s181_s26, %s181_s26 }
   0xd   :  { %p188_p6 = por %p187_p5, %p186_p4 }
   0xf   :  { %p189_p7 = pnand %p188_p6, %p182_p3 }
  0x11   :  { %192 = shalt.err (!%p189_p7)
}
  0x12   :  { %24 = dma.hbm_to_vmem [thread:$0]  %s325_s1, 64, %s22_s16, [#allocation4]  }
  0x13   :  { %s193_s5 = scalar_lea.hbm %s326_s2, 256 }
  0x14   :  { %p194_p8 = scmp.ne.s32.totalorder %s326_s2, %s193_s5  ;;  %p197_p9 = scmp.lt.u32.totalorder %s193_s5, %s326_s2 }
  0x16   :  { %p199_p10 = pnand %p197_p9, %p194_p8 }
  0x18   :  { %202 = shalt.err (!%p199_p10)
}
  0x19   :  { %s203_s10 = scalar_lea.vmem %s275_s18, 256  ;;  %p208_p12 = scmp.lt.s32.totalorder %s275_s18, %s275_s18 }
  0x1a   :  { %p204_p11 = scmp.ne.s32.totalorder %s275_s18, %s203_s10  ;;  %p209_p13 = scmp.lt.s32.totalorder %s203_s10, %s203_s10 }
  0x1c   :  { %p210_p0 = por %p209_p13, %p208_p12 }
  0x1e   :  { %p211_p1 = pnand %p210_p0, %p204_p11 }
  0x20   :  { %214 = shalt.err (!%p211_p1)
}
  0x21   :  { %s245_s1 = smov 64   ;;  %s246_s11 = smov 4  }
  0x22   :  { %36 = dma.hbm_to_vmem [thread:$0]  %s326_s2, 256, %s275_s18, [#allocation7], %s245_s1, %s245_s1, %s246_s11  }
  0x23   :  { %237 = dma.done.wait [#allocation4], 64  }
  0x24   :  { %238 = vsyncadd [#allocation4], 4294967232 }
  0x25   :  { %239 = dma.done.wait [#allocation7], 256  }
  0x26   :  { %240 = vsyncadd [#allocation7], 4294967040  ;;  %v247_v0 = vmov 0.0   ;;  %vm248_vm0 = vmmov 0   ;;  %v169_v1 = vld [vmem:[#allocation6] sm:$0xff]   ;;  %v170_v2 = vld [vmem:[#allocation6 + $0x8] sm:$0xff]   ;;  %v120_v5 = vstv %s324_s0 }
  0x27   :  { %154 = vmatprep.subr.bf16.mxu0 %v247_v0  ;;  %158 = vmatprep.mubr.msk.bf16.mxu0 %vm248_vm0, %v247_v0  ;;  %v52_v3 = vld [vmem:[#allocation3] sm:$0xf]  ;;  %vm69_vm1 = vcmask 261120   ;;  %s249_s17 = smov [#allocation8]  }
  0x28   :  { %155 = vmatpush3.bf16.msra.mxu0 %v169_v1  ;;  %v150_v8 = vld [vmem:[%s327_s3] ss:$0 sm:$0xff]  ;;  %s137_s18 = sshll.u32 %s249_s17, 4  ;;  %s138_s18 = int_to_ptr.vmem [resolvable:$true] %s137_s18 }
  0x29   :  { %156 = vmatprep.subr.bf16.mxu0 %v247_v0  ;;  %s215_s19 = scalar_lea.vmem %s138_s18, 128  ;;  %p220_p3 = scmp.lt.s32.totalorder %s138_s18, %s138_s18 }
  0x2a   :  { %p216_p2 = scmp.ne.s32.totalorder %s138_s18, %s215_s19  ;;  %p221_p4 = scmp.lt.s32.totalorder %s215_s19, %s215_s19 }
  0x2c   :  { %157 = vmatpush3.bf16.msra.mxu0 %v170_v2  ;;  %p222_p5 = por %p221_p4, %p220_p3 }
  0x2e   :  { %p223_p6 = pnand %p222_p5, %p216_p2 }
  0x2f   :  { %159 = vmatmul.mubr.msk.bf16.vlgmr.msra.gmra.mrb[0].mxu0 %vm69_vm1, %v52_v3 }
 0x102   :  { %v107_v4 = vpop.f32.mrb[0].mxu0 }
 0x103   :  { %v160_v6 = vpop.f32.mrb[1].mxu0  ;;  %v121_v10 = vmul.f32 %v120_v5, %v107_v4 }
 0x104   :  { %v110_v7 = vpop.f32.mrb[2].mxu0 }
 0x105   :  { %v161_v9 = vpop.f32.mrb[3].mxu0  ;;  %v129_v11 = vadd.f32 %v150_v8, %v121_v10 }
 0x107   :  { %130 = vst [vmem:[#allocation8] sm:$0xff] %v129_v11 }
 0x108   :  { %226 = shalt.err (!%p223_p6)
}
 0x109   :  { %s227_s21 = scalar_lea.hbm %s328_s4, 128 }
 0x10a   :  { %p228_p7 = scmp.ne.s32.totalorder %s328_s4, %s227_s21  ;;  %p231_p8 = scmp.lt.u32.totalorder %s227_s21, %s328_s4 }
 0x10c   :  { %p233_p9 = pnand %p231_p8, %p228_p7 }
 0x10e   :  { %236 = shalt.err (!%p233_p9)
}
 0x10f   :  { %140 = dma.vmem_to_hbm [thread:$0]  %s138_s18, 128, %s328_s4, [#allocation5]  }
 0x110   :  { %241 = dma.done.wait [#allocation5], 128  }
 0x111   :  { %242 = vsyncadd [#allocation5], 4294967168 }
 0x112   :  { %144 = vsyncpa [#allocation4], 1 }
 0x113   :  { %145 = vsyncpa [#allocation7], 1 }
 0x114   :  { %146 = vsyncpa [#allocation5], 1 }

</bundles_post_ra>
